<compile_context>
chip_gen: v7x
topology: tpu7x:2x2x1
jax: 0.10.0
libtpu: 0.0.40
codegen_flags: <defaults>
</compile_context>

<pallas_src>
import jax
import jax.numpy as jnp
import numpy as np
from jax import lax
from jax.experimental import pallas as pl
from jax.experimental.pallas import tpu as pltpu


def _round_up(x, m):
    return ((x + m - 1) // m) * m


def _tensorcores_per_device():
    """2 TensorCores per JAX device on megacore (v4/v5p) and v7x; else 1."""
    try:
        kind = jax.devices()[0].device_kind.lower()
    except Exception:
        return 1
    two_tc = any(tag in kind for tag in ("v4", "v5p", "v7", "tpu7", "7x"))
    return 2 if two_tc else 1


def _vmem_budget_and_limit():
    """(tile-picker budget, requested scoped-VMEM limit) in bytes, per gen."""
    try:
        cap = int(pltpu.get_tpu_info().vmem_capacity_bytes)
    except Exception:
        cap = 64 * 1024 * 1024          # conservative default: v7x per-TC VMEM
    limit = min(cap // 2, 64 * 1024 * 1024)
    budget = (limit * 3) // 4           # headroom for compiler-internal scratch
    return budget, limit


def _pick_tt(T, bb, Dp, Hp, Pp, budget_bytes, max_tt=8):
    """Largest divisor of T (<= max_tt) whose pipelined buffers fit VMEM."""
    fixed = 2 * 2 * (Dp * Hp + Hp * Hp + Hp * Pp)   # bf16 weights, 2 buffers
    fixed += 2 * 4 * (Hp + Pp)                      # f32 biases, 2 buffers
    fixed += 2 * 2 * 4 * bb * Hp                    # h0 in + hT out blocks
    best = 1
    for tt in range(1, min(T, max_tt) + 1):
        if T % tt:
            continue
        per_block = bb * tt * (2 * 2 * Dp           # x block, bf16, 2 buffers
                               + 2 * 4 * Pp         # params block, f32, 2 buf
                               + 4 * Hp)            # xw/h scratch, f32, 1 buf
        if fixed + per_block <= budget_bytes:
            best = tt
    return best


# ---------------------------------------------------------------------------
# Fused kernel: input projection + serial recurrence + MDN head.
# grid = (Bp // bb, T // TT); batch axis "parallel", time axis "arbitrary".
# The final-hidden output block (constant block index along the time axis,
# i.e. VMEM-resident accumulator) doubles as the carried hidden state.
# ---------------------------------------------------------------------------
def _rnn_mdn_fused_kernel(x_ref, h0_ref, wih_ref, whh_ref, brnn_ref,
                          wfc_ref, bfc_ref, params_ref, hT_ref, scr_ref):
    f32 = jnp.float32
    bf16 = jnp.bfloat16
    t = pl.program_id(1)

    @pl.when(t == 0)
    def _():
        hT_ref[...] = h0_ref[...]

    TT, bb, Dp = x_ref.shape
    Hp = whh_ref.shape[0]
    Pp = wfc_ref.shape[1]

    # (1) Input projection for the whole (TT, bb) block, off the serial path:
    #     one lane-dense bf16 GEMM with f32 accumulation, RNN bias folded in.
    scr_ref[...] = (
        jnp.dot(x_ref[...].reshape(TT * bb, Dp), wih_ref[...],
                preferred_element_type=f32).reshape(TT, bb, Hp)
        + brnn_ref[...])

    whh = whh_ref[...]          # (Hp, Hp) bf16, resident
    # NOTE(perf): further gains possible by staging whh once per grid step via
    # pltpu.matmul_push_rhs / matmul_acc_lhs, and by interleaving 2-4
    # independent batch sub-chains here when bb >= 16 (latency hiding).

    # (2) Serial recurrence: the only per-step work on the dependency chain is
    #     one (bb, Hp) @ (Hp, Hp) bf16 MXU matmul + f32 add + tanh.  The
    #     scratch slot i is reused to hold h_i (xw[i] is dead after step i).
    def step(i, h):
        h = jnp.tanh(scr_ref[i]
                     + jnp.dot(h.astype(bf16), whh,
                               preferred_element_type=f32))
        scr_ref[i] = h
        return h

    h = lax.fori_loop(0, TT, step, hT_ref[...], unroll=True)
    hT_ref[...] = h

    # (3) MDN head for the whole block: one bf16 GEMM straight into the output
    #     block (no (T, Bp, Hp) h_seq HBM round trip, no extra kernel launch).
    params_ref[...] = (
        jnp.dot(scr_ref[...].astype(bf16).reshape(TT * bb, Hp), wfc_ref[...],
                preferred_element_type=f32).reshape(TT, bb, Pp)
        + bfc_ref[...]).astype(params_ref.dtype)


def rnn_mdn_forward(x, hidden, w_ih, w_hh, b_ih, b_hh, w_fc, b_fc):
    """Matches nn.RNN(input_size, hidden_size, batch_first=True) + nn.Linear.

    x: (B, T, D) f32, hidden: (1, B, H) f32 or None.
    Weights in PyTorch shapes: w_ih (H, D), w_hh (H, H), b_ih/b_hh (H,),
    w_fc (P, H), b_fc (P,).  Returns (params (B, T, P), hidden (1, B, H)).
    Matmul operands are rounded to bf16 (f32 accumulation).
    """
    f32, bf16 = jnp.float32, jnp.bfloat16
    B, T, D = x.shape
    H = w_hh.shape[0]
    P = w_fc.shape[0]

    if hidden is None:
        hidden = jnp.zeros((1, B, H), f32)

    # Lane/sublane-dense padded dims.
    Bp = _round_up(max(B, 8), 8)
    Dp = _round_up(D, 128)
    Hp = _round_up(H, 128)
    Pp = _round_up(P, 128)

    # --- XLA-side layout prep: time-major, zero-pad, pre-transpose weights,
    #     pre-cast matmul operands to bf16 (halves x HBM traffic too).
    x_tm = jnp.transpose(x.astype(f32), (1, 0, 2))               # (T, B, D)
    x_tm = jnp.pad(x_tm, ((0, 0), (0, Bp - B), (0, Dp - D))).astype(bf16)
    h0_p = jnp.pad(hidden[0].astype(f32), ((0, Bp - B), (0, Hp - H)))

    wih_t = jnp.pad(jnp.transpose(w_ih).astype(f32),
                    ((0, Dp - D), (0, Hp - H))).astype(bf16)     # (Dp, Hp)
    whh_t = jnp.pad(jnp.transpose(w_hh).astype(f32),
                    ((0, Hp - H), (0, Hp - H))).astype(bf16)     # (Hp, Hp)
    b_rnn = jnp.pad((b_ih + b_hh).astype(f32), (0, Hp - H)).reshape(1, Hp)
    wfc_t = jnp.pad(jnp.transpose(w_fc).astype(f32),
                    ((0, Hp - H), (0, Pp - P))).astype(bf16)     # (Hp, Pp)
    bfc_p = jnp.pad(b_fc.astype(f32), (0, Pp - P)).reshape(1, Pp)

    # Batch split only where a second TensorCore exists (v7x / megacore);
    # on single-TC v5e/v6e a "parallel" split just serializes the recurrence.
    if _tensorcores_per_device() >= 2 and Bp % 16 == 0:
        bb = Bp // 2
    else:
        bb = Bp

    budget, vmem_limit = _vmem_budget_and_limit()
    TT = _pick_tt(T, bb, Dp, Hp, Pp, budget)

    params_tm, h_T = pl.pallas_call(
        _rnn_mdn_fused_kernel,
        out_shape=(jax.ShapeDtypeStruct((T, Bp, Pp), f32),
                   jax.ShapeDtypeStruct((Bp, Hp), f32)),
        grid_spec=pltpu.PrefetchScalarGridSpec(
            num_scalar_prefetch=0,
            grid=(Bp // bb, T // TT),
            in_specs=[
                pl.BlockSpec((TT, bb, Dp), lambda b, t: (t, b, 0)),  # x
                pl.BlockSpec((bb, Hp),     lambda b, t: (b, 0)),     # h0
                pl.BlockSpec((Dp, Hp),     lambda b, t: (0, 0)),     # W_ih^T
                pl.BlockSpec((Hp, Hp),     lambda b, t: (0, 0)),     # W_hh^T
                pl.BlockSpec((1, Hp),      lambda b, t: (0, 0)),     # b_ih+b_hh
                pl.BlockSpec((Hp, Pp),     lambda b, t: (0, 0)),     # W_fc^T
                pl.BlockSpec((1, Pp),      lambda b, t: (0, 0)),     # b_fc
            ],
            out_specs=[
                pl.BlockSpec((TT, bb, Pp), lambda b, t: (t, b, 0)),  # params
                pl.BlockSpec((bb, Hp),     lambda b, t: (b, 0)),     # h_T carry
            ],
            scratch_shapes=[pltpu.VMEM((TT, bb, Hp), f32)],
        ),
        compiler_params=pltpu.CompilerParams(
            dimension_semantics=("parallel", "arbitrary"),
            vmem_limit_bytes=vmem_limit),
    )(x_tm, h0_p, wih_t, whh_t, b_rnn, wfc_t, bfc_p)

    # Final layout fixup + de-padding in XLA.  (Emitting directly in (B, T, P)
    # would need a transposed in-kernel store; left to XLA here.)
    params = jnp.transpose(params_tm[:, :B, :P], (1, 0, 2))          # (B, T, P)
    hidden_out = h_T[:B, :H][None]                                   # (1, B, H)
    return params, hidden_out


def _uniform(key, shape, bound):
    return jax.random.uniform(key, shape, jnp.float32, -bound, bound)


def init_params(key, input_size, hidden_size, latent_dim, num_gaussians):
    P = num_gaussians * (2 * latent_dim + 1)
    k = 1.0 / np.sqrt(hidden_size)
    keys = jax.random.split(key, 6)
    return dict(
        w_ih=_uniform(keys[0], (hidden_size, input_size), k),
        w_hh=_uniform(keys[1], (hidden_size, hidden_size), k),
        b_ih=_uniform(keys[2], (hidden_size,), k),
        b_hh=_uniform(keys[3], (hidden_size,), k),
        w_fc=_uniform(keys[4], (P, hidden_size), k),
        b_fc=_uniform(keys[5], (P,), k),
    )


def _reference_forward(x, hidden, p, bf16_matmuls):
    """Pure-JAX reference of nn.RNN(batch_first=True, tanh) + Linear.

    With bf16_matmuls=True the matmul operands are rounded to bf16 with f32
    accumulation, matching the kernel's MXU numerics exactly (padding is 0).
    """
    f32, bf16 = jnp.float32, jnp.bfloat16
    op = bf16 if bf16_matmuls else f32
    B, T, D = x.shape
    H = p["w_hh"].shape[0]
    h = jnp.zeros((B, H), f32) if hidden is None else hidden[0].astype(f32)
    wih_t = p["w_ih"].T.astype(op)
    whh_t = p["w_hh"].T.astype(op)
    wfc_t = p["w_fc"].T.astype(op)
    b_rnn = (p["b_ih"] + p["b_hh"]).astype(f32)
    outs = []
    for t in range(T):
        xw = jnp.dot(x[:, t].astype(op), wih_t,
                     preferred_element_type=f32) + b_rnn
        h = jnp.tanh(xw + jnp.dot(h.astype(op), whh_t,
                                  preferred_element_type=f32))
        outs.append(h)
    out = jnp.stack(outs, axis=1)                                  # (B, T, H)
    params = jnp.dot(out.astype(op), wfc_t,
                     preferred_element_type=f32) + p["b_fc"].astype(f32)
    return params, h[None]


if __name__ == "__main__":
    B, T = 2, 8
    input_size, hidden_size = 32, 32
    latent_dim, num_gaussians = 8, 5
    P = num_gaussians * (2 * latent_dim + 1)

    key = jax.random.PRNGKey(0)
    kx, kh, kp = jax.random.split(key, 3)
    x = jax.random.normal(kx, (B, T, input_size), jnp.float32)
    hidden = jax.random.normal(kh, (1, B, hidden_size), jnp.float32)
    pd = init_params(kp, input_size, hidden_size, latent_dim, num_gaussians)

    args = (pd["w_ih"], pd["w_hh"], pd["b_ih"], pd["b_hh"],
            pd["w_fc"], pd["b_fc"])

    # --- With an explicit initial hidden state.
    mdn_params, h_out = rnn_mdn_forward(x, hidden, *args)
    mdn_params = jax.block_until_ready(mdn_params)
    h_out = jax.block_until_ready(h_out)

    # Tight check against a bf16-operand-matched reference.
    ref_p_bf, ref_h_bf = _reference_forward(x, hidden, pd, bf16_matmuls=True)
    np.testing.assert_allclose(np.asarray(mdn_params), np.asarray(ref_p_bf),
                               rtol=1e-3, atol=1e-3)
    np.testing.assert_allclose(np.asarray(h_out), np.asarray(ref_h_bf),
                               rtol=1e-3, atol=1e-3)
    # Loose semantic check against the full-f32 PyTorch-equivalent reference.
    ref_p_f32, ref_h_f32 = _reference_forward(x, hidden, pd, bf16_matmuls=False)
    np.testing.assert_allclose(np.asarray(mdn_params), np.asarray(ref_p_f32),
                               rtol=5e-2, atol=5e-2)
    np.testing.assert_allclose(np.asarray(h_out), np.asarray(ref_h_f32),
                               rtol=5e-2, atol=5e-2)

    # --- With hidden=None (matches nn.RNN default zero state).
    mdn_params0, h_out0 = rnn_mdn_forward(x, None, *args)
    mdn_params0 = jax.block_until_ready(mdn_params0)
    h_out0 = jax.block_until_ready(h_out0)
    ref_p0_bf, ref_h0_bf = _reference_forward(x, None, pd, bf16_matmuls=True)
    np.testing.assert_allclose(np.asarray(mdn_params0), np.asarray(ref_p0_bf),
                               rtol=1e-3, atol=1e-3)
    np.testing.assert_allclose(np.asarray(h_out0), np.asarray(ref_h0_bf),
                               rtol=1e-3, atol=1e-3)

    assert mdn_params.shape == (B, T, P)
    assert h_out.shape == (1, B, hidden_size)
    print("KERNEL_OK")
</pallas_src>

<mosaic_0001>
module attributes {stable_mosaic.version = 11 : i64} {
  func.func @_rnn_mdn_fused_kernel(%arg0: i32, %arg1: i32, %arg2: memref<8x8x128xbf16, #tpu.memory_space<vmem>>, %arg3: memref<8x128xf32, #tpu.memory_space<vmem>>, %arg4: memref<128x128xbf16, #tpu.memory_space<vmem>>, %arg5: memref<128x128xbf16, #tpu.memory_space<vmem>>, %arg6: memref<1x128xf32, #tpu.memory_space<vmem>>, %arg7: memref<128x128xbf16, #tpu.memory_space<vmem>>, %arg8: memref<1x128xf32, #tpu.memory_space<vmem>>, %arg9: memref<8x8x128xf32, #tpu.memory_space<vmem>>, %arg10: memref<8x128xf32, #tpu.memory_space<vmem>>, %arg11: memref<8x8x128xf32, #tpu.memory_space<vmem>>) attributes {dimension_semantics = [#tpu.dimension_semantics<parallel>, #tpu.dimension_semantics<arbitrary>], iteration_bounds = array<i64: 1, 1>, scalar_prefetch = 0 : i64, scratch_operands = 1 : i64, tpu.core_type = #tpu.core_type<tc>, window_params = [{transform_indices = @transform_0, window_bounds = array<i64: 8, 8, 128>}, {transform_indices = @transform_1, window_bounds = array<i64: 8, 128>}, {pipeline_mode = #tpu.pipeline_mode<synchronous>, transform_indices = @transform_2, window_bounds = array<i64: 128, 128>}, {pipeline_mode = #tpu.pipeline_mode<synchronous>, transform_indices = @transform_3, window_bounds = array<i64: 128, 128>}, {pipeline_mode = #tpu.pipeline_mode<synchronous>, transform_indices = @transform_4, window_bounds = array<i64: 1, 128>}, {pipeline_mode = #tpu.pipeline_mode<synchronous>, transform_indices = @transform_5, window_bounds = array<i64: 128, 128>}, {pipeline_mode = #tpu.pipeline_mode<synchronous>, transform_indices = @transform_6, window_bounds = array<i64: 1, 128>}, {transform_indices = @transform_7, window_bounds = array<i64: 8, 8, 128>}, {transform_indices = @transform_8, window_bounds = array<i64: 8, 128>}]} {
    %c0_i32 = arith.constant 0 : i32
    %0 = arith.cmpi eq, %arg1, %c0_i32 : i32
    %1 = arith.extui %0 : i1 to i32
    %c0_i32_0 = arith.constant 0 : i32
    %2 = arith.cmpi ne, %1, %c0_i32_0 : i32
    scf.if %2 {
      %c0_68 = arith.constant 0 : index
      %c0_69 = arith.constant 0 : index
      %115 = vector.load %arg3[%c0_68, %c0_69] : memref<8x128xf32, #tpu.memory_space<vmem>>, vector<8x128xf32>
      %c0_70 = arith.constant 0 : index
      %c0_71 = arith.constant 0 : index
      %116 = vector.load %arg10[%c0_70, %c0_71] : memref<8x128xf32, #tpu.memory_space<vmem>>, vector<8x128xf32>
      tpu.vector_store %arg10[%c0_70, %c0_71], %115 {strides = array<i32>} : memref<8x128xf32, #tpu.memory_space<vmem>>, vector<8x128xf32>,
    } else {
    }
    %c0 = arith.constant 0 : index
    %c0_1 = arith.constant 0 : index
    %c0_2 = arith.constant 0 : index
    %3 = vector.load %arg2[%c0, %c0_1, %c0_2] : memref<8x8x128xbf16, #tpu.memory_space<vmem>>, vector<8x8x128xbf16>
    %4 = vector.shape_cast %3 : vector<8x8x128xbf16> to vector<64x128xbf16>
    %c0_3 = arith.constant 0 : index
    %c0_4 = arith.constant 0 : index
    %5 = vector.load %arg4[%c0_3, %c0_4] : memref<128x128xbf16, #tpu.memory_space<vmem>>, vector<128x128xbf16>
    %cst = arith.constant dense<0.000000e+00> : vector<64x128xf32>
    %6 = tpu.matmul %4, %5, %cst {dimension_numbers = #tpu.dot_dimension_numbers<[1], [0], [0], [1], [0, 0, 1, 1], [], []>} : vector<64x128xbf16>, vector<128x128xbf16>, vector<64x128xf32> -> vector<64x128xf32>
    %7 = vector.shape_cast %6 : vector<64x128xf32> to vector<8x8x128xf32>
    %c0_5 = arith.constant 0 : index
    %c0_6 = arith.constant 0 : index
    %8 = vector.load %arg6[%c0_5, %c0_6] : memref<1x128xf32, #tpu.memory_space<vmem>>, vector<1x128xf32>
    %9 = vector.shape_cast %8 : vector<1x128xf32> to vector<1x1x128xf32>
    %10 = vector.broadcast %9 : vector<1x1x128xf32> to vector<8x8x128xf32>
    %11 = arith.addf %7, %10 : vector<8x8x128xf32>
    %c0_7 = arith.constant 0 : index
    %c0_8 = arith.constant 0 : index
    %c0_9 = arith.constant 0 : index
    %12 = vector.load %arg11[%c0_7, %c0_8, %c0_9] : memref<8x8x128xf32, #tpu.memory_space<vmem>>, vector<8x8x128xf32>
    tpu.vector_store %arg11[%c0_7, %c0_8, %c0_9], %11 {strides = array<i32>} : memref<8x8x128xf32, #tpu.memory_space<vmem>>, vector<8x8x128xf32>,
    %c0_10 = arith.constant 0 : index
    %c0_11 = arith.constant 0 : index
    %13 = vector.load %arg5[%c0_10, %c0_11] : memref<128x128xbf16, #tpu.memory_space<vmem>>, vector<128x128xbf16>
    %c0_12 = arith.constant 0 : index
    %c0_13 = arith.constant 0 : index
    %14 = vector.load %arg10[%c0_12, %c0_13] : memref<8x128xf32, #tpu.memory_space<vmem>>, vector<8x128xf32>
    %c0_i32_14 = arith.constant 0 : i32
    %15 = arith.index_cast %c0_i32_14 : i32 to index
    %c0_15 = arith.constant 0 : index
    %c0_16 = arith.constant 0 : index
    %16 = vector.load %arg11[%15, %c0_15, %c0_16] : memref<8x8x128xf32, #tpu.memory_space<vmem>>, vector<1x8x128xf32>
    %17 = vector.shape_cast %16 : vector<1x8x128xf32> to vector<8x128xf32>
    %18 = arith.truncf %14 : vector<8x128xf32> to vector<8x128xbf16>
    %cst_17 = arith.constant dense<0.000000e+00> : vector<8x128xf32>
    %19 = tpu.matmul %18, %13, %cst_17 {dimension_numbers = #tpu.dot_dimension_numbers<[1], [0], [0], [1], [0, 0, 1, 1], [], []>} : vector<8x128xbf16>, vector<128x128xbf16>, vector<8x128xf32> -> vector<8x128xf32>
    %20 = arith.addf %17, %19 : vector<8x128xf32>
    %21 = math.tanh %20 : vector<8x128xf32>
    %22 = arith.index_cast %c0_i32_14 : i32 to index
    %c0_18 = arith.constant 0 : index
    %c0_19 = arith.constant 0 : index
    %23 = vector.load %arg11[%22, %c0_18, %c0_19] : memref<8x8x128xf32, #tpu.memory_space<vmem>>, vector<1x8x128xf32>
    %24 = vector.shape_cast %23 : vector<1x8x128xf32> to vector<8x128xf32>
    %25 = vector.shape_cast %21 : vector<8x128xf32> to vector<1x8x128xf32>
    tpu.vector_store %arg11[%22, %c0_18, %c0_19], %25 {strides = array<i32>} : memref<8x8x128xf32, #tpu.memory_space<vmem>>, vector<1x8x128xf32>,
    %c1_i32 = arith.constant 1 : i32
    %26 = arith.index_cast %c1_i32 : i32 to index
    %c0_20 = arith.constant 0 : index
    %c0_21 = arith.constant 0 : index
    %27 = vector.load %arg11[%26, %c0_20, %c0_21] : memref<8x8x128xf32, #tpu.memory_space<vmem>>, vector<1x8x128xf32>
    %28 = vector.shape_cast %27 : vector<1x8x128xf32> to vector<8x128xf32>
    %29 = arith.truncf %21 : vector<8x128xf32> to vector<8x128xbf16>
    %cst_22 = arith.constant dense<0.000000e+00> : vector<8x128xf32>
    %30 = tpu.matmul %29, %13, %cst_22 {dimension_numbers = #tpu.dot_dimension_numbers<[1], [0], [0], [1], [0, 0, 1, 1], [], []>} : vector<8x128xbf16>, vector<128x128xbf16>, vector<8x128xf32> -> vector<8x128xf32>
    %31 = arith.addf %28, %30 : vector<8x128xf32>
    %32 = math.tanh %31 : vector<8x128xf32>
    %33 = arith.index_cast %c1_i32 : i32 to index
    %c0_23 = arith.constant 0 : index
    %c0_24 = arith.constant 0 : index
    %34 = vector.load %arg11[%33, %c0_23, %c0_24] : memref<8x8x128xf32, #tpu.memory_space<vmem>>, vector<1x8x128xf32>
    %35 = vector.shape_cast %34 : vector<1x8x128xf32> to vector<8x128xf32>
    %36 = vector.shape_cast %32 : vector<8x128xf32> to vector<1x8x128xf32>
    tpu.vector_store %arg11[%33, %c0_23, %c0_24], %36 {strides = array<i32>} : memref<8x8x128xf32, #tpu.memory_space<vmem>>, vector<1x8x128xf32>,
    %c2_i32 = arith.constant 2 : i32
    %37 = arith.index_cast %c2_i32 : i32 to index
    %c0_25 = arith.constant 0 : index
    %c0_26 = arith.constant 0 : index
    %38 = vector.load %arg11[%37, %c0_25, %c0_26] : memref<8x8x128xf32, #tpu.memory_space<vmem>>, vector<1x8x128xf32>
    %39 = vector.shape_cast %38 : vector<1x8x128xf32> to vector<8x128xf32>
    %40 = arith.truncf %32 : vector<8x128xf32> to vector<8x128xbf16>
    %cst_27 = arith.constant dense<0.000000e+00> : vector<8x128xf32>
    %41 = tpu.matmul %40, %13, %cst_27 {dimension_numbers = #tpu.dot_dimension_numbers<[1], [0], [0], [1], [0, 0, 1, 1], [], []>} : vector<8x128xbf16>, vector<128x128xbf16>, vector<8x128xf32> -> vector<8x128xf32>
    %42 = arith.addf %39, %41 : vector<8x128xf32>
    %43 = math.tanh %42 : vector<8x128xf32>
    %44 = arith.index_cast %c2_i32 : i32 to index
    %c0_28 = arith.constant 0 : index
    %c0_29 = arith.constant 0 : index
    %45 = vector.load %arg11[%44, %c0_28, %c0_29] : memref<8x8x128xf32, #tpu.memory_space<vmem>>, vector<1x8x128xf32>
    %46 = vector.shape_cast %45 : vector<1x8x128xf32> to vector<8x128xf32>
    %47 = vector.shape_cast %43 : vector<8x128xf32> to vector<1x8x128xf32>
    tpu.vector_store %arg11[%44, %c0_28, %c0_29], %47 {strides = array<i32>} : memref<8x8x128xf32, #tpu.memory_space<vmem>>, vector<1x8x128xf32>,
    %c3_i32 = arith.constant 3 : i32
    %48 = arith.index_cast %c3_i32 : i32 to index
    %c0_30 = arith.constant 0 : index
    %c0_31 = arith.constant 0 : index
    %49 = vector.load %arg11[%48, %c0_30, %c0_31] : memref<8x8x128xf32, #tpu.memory_space<vmem>>, vector<1x8x128xf32>
    %50 = vector.shape_cast %49 : vector<1x8x128xf32> to vector<8x128xf32>
    %51 = arith.truncf %43 : vector<8x128xf32> to vector<8x128xbf16>
    %cst_32 = arith.constant dense<0.000000e+00> : vector<8x128xf32>
    %52 = tpu.matmul %51, %13, %cst_32 {dimension_numbers = #tpu.dot_dimension_numbers<[1], [0], [0], [1], [0, 0, 1, 1], [], []>} : vector<8x128xbf16>, vector<128x128xbf16>, vector<8x128xf32> -> vector<8x128xf32>
    %53 = arith.addf %50, %52 : vector<8x128xf32>
    %54 = math.tanh %53 : vector<8x128xf32>
    %55 = arith.index_cast %c3_i32 : i32 to index
    %c0_33 = arith.constant 0 : index
    %c0_34 = arith.constant 0 : index
    %56 = vector.load %arg11[%55, %c0_33, %c0_34] : memref<8x8x128xf32, #tpu.memory_space<vmem>>, vector<1x8x128xf32>
    %57 = vector.shape_cast %56 : vector<1x8x128xf32> to vector<8x128xf32>
    %58 = vector.shape_cast %54 : vector<8x128xf32> to vector<1x8x128xf32>
    tpu.vector_store %arg11[%55, %c0_33, %c0_34], %58 {strides = array<i32>} : memref<8x8x128xf32, #tpu.memory_space<vmem>>, vector<1x8x128xf32>,
    %c4_i32 = arith.constant 4 : i32
    %59 = arith.index_cast %c4_i32 : i32 to index
    %c0_35 = arith.constant 0 : index
    %c0_36 = arith.constant 0 : index
    %60 = vector.load %arg11[%59, %c0_35, %c0_36] : memref<8x8x128xf32, #tpu.memory_space<vmem>>, vector<1x8x128xf32>
    %61 = vector.shape_cast %60 : vector<1x8x128xf32> to vector<8x128xf32>
    %62 = arith.truncf %54 : vector<8x128xf32> to vector<8x128xbf16>
    %cst_37 = arith.constant dense<0.000000e+00> : vector<8x128xf32>
    %63 = tpu.matmul %62, %13, %cst_37 {dimension_numbers = #tpu.dot_dimension_numbers<[1], [0], [0], [1], [0, 0, 1, 1], [], []>} : vector<8x128xbf16>, vector<128x128xbf16>, vector<8x128xf32> -> vector<8x128xf32>
    %64 = arith.addf %61, %63 : vector<8x128xf32>
    %65 = math.tanh %64 : vector<8x128xf32>
    %66 = arith.index_cast %c4_i32 : i32 to index
    %c0_38 = arith.constant 0 : index
    %c0_39 = arith.constant 0 : index
    %67 = vector.load %arg11[%66, %c0_38, %c0_39] : memref<8x8x128xf32, #tpu.memory_space<vmem>>, vector<1x8x128xf32>
    %68 = vector.shape_cast %67 : vector<1x8x128xf32> to vector<8x128xf32>
    %69 = vector.shape_cast %65 : vector<8x128xf32> to vector<1x8x128xf32>
    tpu.vector_store %arg11[%66, %c0_38, %c0_39], %69 {strides = array<i32>} : memref<8x8x128xf32, #tpu.memory_space<vmem>>, vector<1x8x128xf32>,
    %c5_i32 = arith.constant 5 : i32
    %70 = arith.index_cast %c5_i32 : i32 to index
    %c0_40 = arith.constant 0 : index
    %c0_41 = arith.constant 0 : index
    %71 = vector.load %arg11[%70, %c0_40, %c0_41] : memref<8x8x128xf32, #tpu.memory_space<vmem>>, vector<1x8x128xf32>
    %72 = vector.shape_cast %71 : vector<1x8x128xf32> to vector<8x128xf32>
    %73 = arith.truncf %65 : vector<8x128xf32> to vector<8x128xbf16>
    %cst_42 = arith.constant dense<0.000000e+00> : vector<8x128xf32>
    %74 = tpu.matmul %73, %13, %cst_42 {dimension_numbers = #tpu.dot_dimension_numbers<[1], [0], [0], [1], [0, 0, 1, 1], [], []>} : vector<8x128xbf16>, vector<128x128xbf16>, vector<8x128xf32> -> vector<8x128xf32>
    %75 = arith.addf %72, %74 : vector<8x128xf32>
    %76 = math.tanh %75 : vector<8x128xf32>
    %77 = arith.index_cast %c5_i32 : i32 to index
    %c0_43 = arith.constant 0 : index
    %c0_44 = arith.constant 0 : index
    %78 = vector.load %arg11[%77, %c0_43, %c0_44] : memref<8x8x128xf32, #tpu.memory_space<vmem>>, vector<1x8x128xf32>
    %79 = vector.shape_cast %78 : vector<1x8x128xf32> to vector<8x128xf32>
    %80 = vector.shape_cast %76 : vector<8x128xf32> to vector<1x8x128xf32>
    tpu.vector_store %arg11[%77, %c0_43, %c0_44], %80 {strides = array<i32>} : memref<8x8x128xf32, #tpu.memory_space<vmem>>, vector<1x8x128xf32>,
    %c6_i32 = arith.constant 6 : i32
    %81 = arith.index_cast %c6_i32 : i32 to index
    %c0_45 = arith.constant 0 : index
    %c0_46 = arith.constant 0 : index
    %82 = vector.load %arg11[%81, %c0_45, %c0_46] : memref<8x8x128xf32, #tpu.memory_space<vmem>>, vector<1x8x128xf32>
    %83 = vector.shape_cast %82 : vector<1x8x128xf32> to vector<8x128xf32>
    %84 = arith.truncf %76 : vector<8x128xf32> to vector<8x128xbf16>
    %cst_47 = arith.constant dense<0.000000e+00> : vector<8x128xf32>
    %85 = tpu.matmul %84, %13, %cst_47 {dimension_numbers = #tpu.dot_dimension_numbers<[1], [0], [0], [1], [0, 0, 1, 1], [], []>} : vector<8x128xbf16>, vector<128x128xbf16>, vector<8x128xf32> -> vector<8x128xf32>
    %86 = arith.addf %83, %85 : vector<8x128xf32>
    %87 = math.tanh %86 : vector<8x128xf32>
    %88 = arith.index_cast %c6_i32 : i32 to index
    %c0_48 = arith.constant 0 : index
    %c0_49 = arith.constant 0 : index
    %89 = vector.load %arg11[%88, %c0_48, %c0_49] : memref<8x8x128xf32, #tpu.memory_space<vmem>>, vector<1x8x128xf32>
    %90 = vector.shape_cast %89 : vector<1x8x128xf32> to vector<8x128xf32>
    %91 = vector.shape_cast %87 : vector<8x128xf32> to vector<1x8x128xf32>
    tpu.vector_store %arg11[%88, %c0_48, %c0_49], %91 {strides = array<i32>} : memref<8x8x128xf32, #tpu.memory_space<vmem>>, vector<1x8x128xf32>,
    %c7_i32 = arith.constant 7 : i32
    %92 = arith.index_cast %c7_i32 : i32 to index
    %c0_50 = arith.constant 0 : index
    %c0_51 = arith.constant 0 : index
    %93 = vector.load %arg11[%92, %c0_50, %c0_51] : memref<8x8x128xf32, #tpu.memory_space<vmem>>, vector<1x8x128xf32>
    %94 = vector.shape_cast %93 : vector<1x8x128xf32> to vector<8x128xf32>
    %95 = arith.truncf %87 : vector<8x128xf32> to vector<8x128xbf16>
    %cst_52 = arith.constant dense<0.000000e+00> : vector<8x128xf32>
    %96 = tpu.matmul %95, %13, %cst_52 {dimension_numbers = #tpu.dot_dimension_numbers<[1], [0], [0], [1], [0, 0, 1, 1], [], []>} : vector<8x128xbf16>, vector<128x128xbf16>, vector<8x128xf32> -> vector<8x128xf32>
    %97 = arith.addf %94, %96 : vector<8x128xf32>
    %98 = math.tanh %97 : vector<8x128xf32>
    %99 = arith.index_cast %c7_i32 : i32 to index
    %c0_53 = arith.constant 0 : index
    %c0_54 = arith.constant 0 : index
    %100 = vector.load %arg11[%99, %c0_53, %c0_54] : memref<8x8x128xf32, #tpu.memory_space<vmem>>, vector<1x8x128xf32>
    %101 = vector.shape_cast %100 : vector<1x8x128xf32> to vector<8x128xf32>
    %102 = vector.shape_cast %98 : vector<8x128xf32> to vector<1x8x128xf32>
    tpu.vector_store %arg11[%99, %c0_53, %c0_54], %102 {strides = array<i32>} : memref<8x8x128xf32, #tpu.memory_space<vmem>>, vector<1x8x128xf32>,
    %c8_i32 = arith.constant 8 : i32
    %c0_55 = arith.constant 0 : index
    %c0_56 = arith.constant 0 : index
    %103 = vector.load %arg10[%c0_55, %c0_56] : memref<8x128xf32, #tpu.memory_space<vmem>>, vector<8x128xf32>
    tpu.vector_store %arg10[%c0_55, %c0_56], %98 {strides = array<i32>} : memref<8x128xf32, #tpu.memory_space<vmem>>, vector<8x128xf32>,
    %c0_57 = arith.constant 0 : index
    %c0_58 = arith.constant 0 : index
    %c0_59 = arith.constant 0 : index
    %104 = vector.load %arg11[%c0_57, %c0_58, %c0_59] : memref<8x8x128xf32, #tpu.memory_space<vmem>>, vector<8x8x128xf32>
    %105 = arith.truncf %104 : vector<8x8x128xf32> to vector<8x8x128xbf16>
    %106 = vector.shape_cast %105 : vector<8x8x128xbf16> to vector<64x128xbf16>
    %c0_60 = arith.constant 0 : index
    %c0_61 = arith.constant 0 : index
    %107 = vector.load %arg7[%c0_60, %c0_61] : memref<128x128xbf16, #tpu.memory_space<vmem>>, vector<128x128xbf16>
    %cst_62 = arith.constant dense<0.000000e+00> : vector<64x128xf32>
    %108 = tpu.matmul %106, %107, %cst_62 {dimension_numbers = #tpu.dot_dimension_numbers<[1], [0], [0], [1], [0, 0, 1, 1], [], []>} : vector<64x128xbf16>, vector<128x128xbf16>, vector<64x128xf32> -> vector<64x128xf32>
    %109 = vector.shape_cast %108 : vector<64x128xf32> to vector<8x8x128xf32>
    %c0_63 = arith.constant 0 : index
    %c0_64 = arith.constant 0 : index
    %110 = vector.load %arg8[%c0_63, %c0_64] : memref<1x128xf32, #tpu.memory_space<vmem>>, vector<1x128xf32>
    %111 = vector.shape_cast %110 : vector<1x128xf32> to vector<1x1x128xf32>
    %112 = vector.broadcast %111 : vector<1x1x128xf32> to vector<8x8x128xf32>
    %113 = arith.addf %109, %112 : vector<8x8x128xf32>
    %c0_65 = arith.constant 0 : index
    %c0_66 = arith.constant 0 : index
    %c0_67 = arith.constant 0 : index
    %114 = vector.load %arg9[%c0_65, %c0_66, %c0_67] : memref<8x8x128xf32, #tpu.memory_space<vmem>>, vector<8x8x128xf32>
    tpu.vector_store %arg9[%c0_65, %c0_66, %c0_67], %113 {strides = array<i32>} : memref<8x8x128xf32, #tpu.memory_space<vmem>>, vector<8x8x128xf32>,
    return
  }
  func.func @transform_0(%arg0: i32, %arg1: i32) -> (i32, i32, i32) {
    %c0_i32 = arith.constant 0 : i32
    %c0_i32_0 = arith.constant 0 : i32
    return %arg1, %arg0, %c0_i32 : i32, i32, i32
  }
  func.func @transform_1(%arg0: i32, %arg1: i32) -> (i32, i32) {
    %c0_i32 = arith.constant 0 : i32
    %c0_i32_0 = arith.constant 0 : i32
    return %arg0, %c0_i32 : i32, i32
  }
  func.func @transform_2(%arg0: i32, %arg1: i32) -> (i32, i32) {
    %c0_i32 = arith.constant 0 : i32
    %c0_i32_0 = arith.constant 0 : i32
    %c0_i32_1 = arith.constant 0 : i32
    return %c0_i32, %c0_i32_0 : i32, i32
  }
  func.func @transform_3(%arg0: i32, %arg1: i32) -> (i32, i32) {
    %c0_i32 = arith.constant 0 : i32
    %c0_i32_0 = arith.constant 0 : i32
    %c0_i32_1 = arith.constant 0 : i32
    return %c0_i32, %c0_i32_0 : i32, i32
  }
  func.func @transform_4(%arg0: i32, %arg1: i32) -> (i32, i32) {
    %c0_i32 = arith.constant 0 : i32
    %c0_i32_0 = arith.constant 0 : i32
    %c0_i32_1 = arith.constant 0 : i32
    return %c0_i32, %c0_i32_0 : i32, i32
  }
  func.func @transform_5(%arg0: i32, %arg1: i32) -> (i32, i32) {
    %c0_i32 = arith.constant 0 : i32
    %c0_i32_0 = arith.constant 0 : i32
    %c0_i32_1 = arith.constant 0 : i32
    return %c0_i32, %c0_i32_0 : i32, i32
  }
  func.func @transform_6(%arg0: i32, %arg1: i32) -> (i32, i32) {
    %c0_i32 = arith.constant 0 : i32
    %c0_i32_0 = arith.constant 0 : i32
    %c0_i32_1 = arith.constant 0 : i32
    return %c0_i32, %c0_i32_0 : i32, i32
  }
  func.func @transform_7(%arg0: i32, %arg1: i32) -> (i32, i32, i32) {
    %c0_i32 = arith.constant 0 : i32
    %c0_i32_0 = arith.constant 0 : i32
    return %arg1, %arg0, %c0_i32 : i32, i32, i32
  }
  func.func @transform_8(%arg0: i32, %arg1: i32) -> (i32, i32) {
    %c0_i32 = arith.constant 0 : i32
    %c0_i32_0 = arith.constant 0 : i32
    return %arg0, %c0_i32 : i32, i32
  }
}

</mosaic_0001>

<bundles_post_ra>
// kernel: tpu_custom_call.1
= control target key start
LH: loop header
LB: loop body
LE: loop exit
PB: predicated region body
PF: predicated region fallthrough
CT: control target
= control target key end

     0   :  { %14 = vsyncpa [#allocation4], 0  ;;  %s1873_s0 = inlined_call_operand.hbm [shape: bf16[8,8,128], index: 0, kind: input, shape index: {}]   ;;  %s1874_s1 = inlined_call_operand.hbm [shape: f32[8,128], index: 1, kind: input, shape index: {}]   ;;  %s1875_s2 = inlined_call_operand.hbm [shape: bf16[128,128], index: 2, kind: input, shape index: {}]   ;;  %s1876_s3 = inlined_call_operand.hbm [shape: bf16[128,128], index: 3, kind: input, shape index: {}]   ;;  %s1877_s4 = inlined_call_operand.vmem [shape: f32[1,128], index: 4, kind: input, shape index: {}]   ;;  %s1878_s5 = inlined_call_operand.hbm [shape: bf16[128,128], index: 5, kind: input, shape index: {}]   ;;  %s1879_s6 = inlined_call_operand.vmem [shape: f32[1,128], index: 6, kind: input, shape index: {}]   ;;  %s1880_s7 = inlined_call_operand.hbm [shape: f32[8,8,128], index: 7, kind: output, shape index: {0}]   ;;  %s1881_s8 = inlined_call_operand.hbm [shape: f32[8,128], index: 8, kind: output, shape index: {1}]  }
   0x1   :  { %15 = vsyncpa [#allocation7], 0 }
   0x2   :  { %16 = vsyncpa [#allocation10], 0 }
   0x3   :  { %17 = vsyncpa [#allocation5], 0 }
   0x4   :  { %18 = vsyncpa [#allocation14], 0  ;;  %s1508_s27 = smov [#allocation6]   ;;  %s1344_s9 = scalar_lea.hbm %s1874_s1, 128 }
   0x5   :  { %s37_s28 = sshll.u32 %s1508_s27, 4  ;;  %p1345_p0 = scmp.ne.s32.totalorder %s1874_s1, %s1344_s9  ;;  %s38_s28 = int_to_ptr.vmem [resolvable:$true] %s37_s28 }
   0x6   :  { %p1348_p1 = scmp.lt.u32.totalorder %s1344_s9, %s1874_s1 }
   0x8   :  { %p1350_p2 = pnand %p1348_p1, %p1345_p0 }
   0xa   :  { %1353 = shalt.err (!%p1350_p2)
}
   0xb   :  { %s1354_s14 = scalar_lea.vmem %s38_s28, 128  ;;  %p1359_p4 = scmp.lt.s32.totalorder %s38_s28, %s38_s28 }
   0xc   :  { %p1355_p3 = scmp.ne.s32.totalorder %s38_s28, %s1354_s14  ;;  %p1360_p5 = scmp.lt.s32.totalorder %s1354_s14, %s1354_s14 }
   0xe   :  { %p1361_p6 = por %p1360_p5, %p1359_p4 }
  0x10   :  { %p1362_p7 = pnand %p1361_p6, %p1355_p3 }
  0x12   :  { %1365 = shalt.err (!%p1362_p7)
}
  0x13   :  { %40 = dma.hbm_to_vmem [thread:$0]  %s1874_s1, 128, %s38_s28, [#allocation7]  }
  0x14   :  { %s1509_s17 = smov [#allocation9]   ;;  %s1510_s19 = smov [#allocation3]  }
  0x15   :  { %s58_s18 = sshll.u32 %s1509_s17, 4  ;;  %s24_s20 = sshll.u32 %s1510_s19, 4  ;;  %s59_s18 = int_to_ptr.vmem [resolvable:$true] %s58_s18  ;;  %s25_s20 = int_to_ptr.vmem [resolvable:$true] %s24_s20 }
  0x16   :  { %s1366_s23 = scalar_lea.hbm %s1876_s3, 1024 }
  0x17   :  { %p1367_p8 = scmp.ne.s32.totalorder %s1876_s3, %s1366_s23  ;;  %p1370_p9 = scmp.lt.u32.totalorder %s1366_s23, %s1876_s3 }
  0x19   :  { %p1372_p10 = pnand %p1370_p9, %p1367_p8 }
  0x1b   :  { %1375 = shalt.err (!%p1372_p10)
}
  0x1c   :  { %s1376_s1 = scalar_lea.vmem %s59_s18, 1024  ;;  %p1381_p12 = scmp.lt.s32.totalorder %s59_s18, %s59_s18 }
  0x1d   :  { %p1377_p11 = scmp.ne.s32.totalorder %s59_s18, %s1376_s1  ;;  %p1382_p13 = scmp.lt.s32.totalorder %s1376_s1, %s1376_s1 }
  0x1f   :  { %p1383_p0 = por %p1382_p13, %p1381_p12 }
  0x21   :  { %p1384_p1 = pnand %p1383_p0, %p1377_p11 }
  0x23   :  { %1387 = shalt.err (!%p1384_p1)
}
  0x24   :  { %s1511_s28 = smov 64   ;;  %s1512_s29 = smov 4  }
  0x25   :  { %64 = dma.hbm_to_vmem [thread:$0]  %s1876_s3, 1024, %s59_s18, [#allocation10], %s1511_s28, %s1511_s28, %s1512_s29  }
  0x26   :  { %s1388_s12 = scalar_lea.hbm %s1873_s0, 512 }
  0x27   :  { %p1389_p2 = scmp.ne.s32.totalorder %s1873_s0, %s1388_s12  ;;  %p1392_p3 = scmp.lt.u32.totalorder %s1388_s12, %s1873_s0 }
  0x29   :  { %p1394_p4 = pnand %p1392_p3, %p1389_p2 }
  0x2b   :  { %1397 = shalt.err (!%p1394_p4)
}
  0x2c   :  { %s1398_s17 = scalar_lea.vmem %s25_s20, 512  ;;  %p1403_p6 = scmp.lt.s32.totalorder %s25_s20, %s25_s20 }
  0x2d   :  { %p1399_p5 = scmp.ne.s32.totalorder %s25_s20, %s1398_s17  ;;  %p1404_p7 = scmp.lt.s32.totalorder %s1398_s17, %s1398_s17 }
  0x2f   :  { %p1405_p8 = por %p1404_p7, %p1403_p6 }
  0x31   :  { %p1406_p9 = pnand %p1405_p8, %p1399_p5 }
  0x33   :  { %1409 = shalt.err (!%p1406_p9)
}
  0x34   :  { %30 = dma.hbm_to_vmem [thread:$0]  %s1873_s0, 512, %s25_s20, [#allocation4], %s1511_s28, %s1511_s28, %s1512_s29  }
  0x35   :  { %s1513_s19 = smov [#allocation8]   ;;  %s1514_s22 = smov [#allocation11]  }
  0x36   :  { %s46_s21 = sshll.u32 %s1513_s19, 4  ;;  %s72_s23 = sshll.u32 %s1514_s22, 4  ;;  %s47_s21 = int_to_ptr.vmem [resolvable:$true] %s46_s21  ;;  %s73_s23 = int_to_ptr.vmem [resolvable:$true] %s72_s23 }
  0x37   :  { %s1410_s26 = scalar_lea.hbm %s1875_s2, 1024 }
  0x38   :  { %p1411_p10 = scmp.ne.s32.totalorder %s1875_s2, %s1410_s26  ;;  %p1414_p11 = scmp.lt.u32.totalorder %s1410_s26, %s1875_s2 }
  0x3a   :  { %p1416_p12 = pnand %p1414_p11, %p1411_p10 }
  0x3c   :  { %1419 = shalt.err (!%p1416_p12)
}
  0x3d   :  { %s1420_s0 = scalar_lea.vmem %s47_s21, 1024  ;;  %p1425_p0 = scmp.lt.s32.totalorder %s47_s21, %s47_s21 }
  0x3e   :  { %p1421_p13 = scmp.ne.s32.totalorder %s47_s21, %s1420_s0  ;;  %p1426_p1 = scmp.lt.s32.totalorder %s1420_s0, %s1420_s0 }
  0x40   :  { %p1427_p2 = por %p1426_p1, %p1425_p0 }
  0x42   :  { %p1428_p3 = pnand %p1427_p2, %p1421_p13 }
  0x44   :  { %1431 = shalt.err (!%p1428_p3)
}
  0x45   :  { %52 = dma.hbm_to_vmem [thread:$0]  %s1875_s2, 1024, %s47_s21, [#allocation7], %s1511_s28, %s1511_s28, %s1512_s29  }
  0x46   :  { %s1432_s13 = scalar_lea.hbm %s1878_s5, 1024 }
  0x47   :  { %p1433_p4 = scmp.ne.s32.totalorder %s1878_s5, %s1432_s13  ;;  %p1436_p5 = scmp.lt.u32.totalorder %s1432_s13, %s1878_s5 }
  0x49   :  { %p1438_p6 = pnand %p1436_p5, %p1433_p4 }
  0x4b   :  { %1441 = shalt.err (!%p1438_p6)
}
  0x4c   :  { %s1442_s3 = scalar_lea.vmem %s73_s23, 1024  ;;  %p1447_p8 = scmp.lt.s32.totalorder %s73_s23, %s73_s23 }
  0x4d   :  { %p1443_p7 = scmp.ne.s32.totalorder %s73_s23, %s1442_s3  ;;  %p1448_p9 = scmp.lt.s32.totalorder %s1442_s3, %s1442_s3 }
  0x4f   :  { %p1449_p10 = por %p1448_p9, %p1447_p8 }
  0x51   :  { %p1450_p11 = pnand %p1449_p10, %p1443_p7 }
  0x53   :  { %1453 = shalt.err (!%p1450_p11)
}
  0x54   :  { %78 = dma.hbm_to_vmem [thread:$0]  %s1878_s5, 1024, %s73_s23, [#allocation10], %s1511_s28, %s1511_s28, %s1512_s29  }
  0x55   :  { %1498 = dma.done.wait [#allocation4], 512  }
  0x56   :  { %1499 = vsyncadd [#allocation4], 4294966784 }
  0x57   :  { %1500 = dma.done.wait [#allocation7], 1152  }
  0x58   :  { %1501 = vsyncadd [#allocation7], 4294966144 }
  0x59   :  { %1502 = dma.done.wait [#allocation10], 2048  }
  0x5a   :  { %1503 = vsyncadd [#allocation10], 4294965248  ;;  %v1515_v0 = vmov 0.0   ;;  %vm1516_vm0 = vmmov 0   ;;  %v1300_v1 = vld [vmem:[#allocation8] sm:$0xff]   ;;  %v1302_v3 = vld [vmem:[#allocation8 + $0x8] sm:$0xff]  }
  0x5b   :  { %1103 = vmatprep.subr.bf16.mxu1 %v1515_v0  ;;  %1119 = vmatprep.mubr.msk.bf16.mxu1 %vm1516_vm0, %v1515_v0  ;;  %v1641_v2 = vld [vmem:[#allocation9] sm:$0xff]   ;;  %v1644_v4 = vld [vmem:[#allocation9 + $0x8] sm:$0xff]   ;;  %v1304_v5 = vld [vmem:[#allocation8 + $0x10] sm:$0xff]  }
  0x5c   :  { %1079 = vmatprep.subr.bf16.mxu0 %v1300_v1  ;;  %1104 = vmatpush3.bf16.msra.mxu1 %v1641_v2  ;;  %v1648_v6 = vld [vmem:[#allocation9 + $0x10] sm:$0xff]   ;;  %v1306_v7 = vld [vmem:[#allocation8 + $0x18] sm:$0xff]   ;;  %v1308_v9 = vld [vmem:[#allocation8 + $0x20] sm:$0xff]  }
  0x5d   :  { %1080 = vmatpush3.bf16.msra.mxu0 %v1300_v1  ;;  %1105 = vmatprep.subr.bf16.mxu1 %v1515_v0  ;;  %v1652_v8 = vld [vmem:[#allocation9 + $0x18] sm:$0xff]   ;;  %v1655_v10 = vld [vmem:[#allocation9 + $0x20] sm:$0xff]   ;;  %v1310_v11 = vld [vmem:[#allocation8 + $0x28] sm:$0xff]  }
  0x5e   :  { %1081 = vmatprep.subr.bf16.mxu0 %v1302_v3  ;;  %v1316_v12 = vld [vmem:[#allocation3] sm:$0xff]   ;;  %v1659_v13 = vld [vmem:[#allocation9 + $0x28] sm:$0xff]   ;;  %v1312_v14 = vld [vmem:[#allocation8 + $0x30] sm:$0xff]  }
  0x5f   :  { %1095 = vmatprep.mubr.bf16.mxu0 %v1316_v12  ;;  %v1663_v15 = vld [vmem:[#allocation9 + $0x30] sm:$0xff]   ;;  %v1314_v16 = vld [vmem:[#allocation8 + $0x38] sm:$0xff]   ;;  %v1317_v19 = vld [vmem:[#allocation3 + $0x8] sm:$0xff]  }
  0x60   :  { %1106 = vmatpush3.bf16.msra.mxu1 %v1644_v4  ;;  %v1668_v17 = vld [vmem:[#allocation9 + $0x38] sm:$0xff]   ;;  %v1318_v21 = vld [vmem:[#allocation3 + $0x10] sm:$0xff]   ;;  %v1319_v22 = vld [vmem:[#allocation3 + $0x18] sm:$0xff]  }
  0x61   :  { %1082 = vmatpush3.bf16.msra.mxu0 %v1302_v3  ;;  %1107 = vmatprep.subr.bf16.mxu1 %v1515_v0  ;;  %v101_v18 = vld [vmem:[#allocation6] sm:$0xff] }
  0x62   :  { %1083 = vmatprep.subr.bf16.mxu0 %v1304_v5  ;;  %v305_v20 = vpack.c.bf16 %v101_v18, %v101_v18  ;;  %v1713_v23 = vld [vmem:[%s1877_s4] ss:$0 sm:$0xff] }
  0x64   :  { %1108 = vmatpush3.bf16.msra.mxu1 %v1648_v6 }
  0x65   :  { %1084 = vmatpush3.bf16.msra.mxu0 %v1304_v5  ;;  %1109 = vmatprep.subr.bf16.mxu1 %v1515_v0 }
  0x66   :  { %1085 = vmatprep.subr.bf16.mxu0 %v1306_v7 }
  0x68   :  { %1110 = vmatpush3.bf16.msra.mxu1 %v1652_v8 }
  0x69   :  { %1086 = vmatpush3.bf16.msra.mxu0 %v1306_v7  ;;  %1111 = vmatprep.subr.bf16.mxu1 %v1515_v0 }
  0x6a   :  { %1087 = vmatprep.subr.bf16.mxu0 %v1308_v9 }
  0x6c   :  { %1112 = vmatpush3.bf16.msra.mxu1 %v1655_v10 }
  0x6d   :  { %1088 = vmatpush3.bf16.msra.mxu0 %v1308_v9  ;;  %1113 = vmatprep.subr.bf16.mxu1 %v1515_v0 }
  0x6e   :  { %1089 = vmatprep.subr.bf16.mxu0 %v1310_v11 }
  0x70   :  { %1114 = vmatpush3.bf16.msra.mxu1 %v1659_v13 }
  0x71   :  { %1090 = vmatpush3.bf16.msra.mxu0 %v1310_v11  ;;  %1115 = vmatprep.subr.bf16.mxu1 %v1515_v0 }
  0x72   :  { %1091 = vmatprep.subr.bf16.mxu0 %v1312_v14 }
  0x74   :  { %1116 = vmatpush3.bf16.msra.mxu1 %v1663_v15 }
  0x75   :  { %1092 = vmatpush3.bf16.msra.mxu0 %v1312_v14  ;;  %1117 = vmatprep.subr.bf16.mxu1 %v1515_v0 }
  0x76   :  { %1093 = vmatprep.subr.bf16.mxu0 %v1314_v16 }
  0x78   :  { %1118 = vmatpush3.bf16.msra.mxu1 %v1668_v17 }
  0x79   :  { %1094 = vmatpush3.bf16.msra.mxu0 %v1314_v16  ;;  %1143 = vmatprep.subr.bf16.mxu1 %v1515_v0 }
  0x7a   :  { %1123 = vmatprep.subr.bf16.mxu0 %v1515_v0 }
  0x7b   :  { %1120 = vmatmul.mubr.bf16.vlgmr.msra.gmra.mrb[0].mxu1 %v305_v20  ;;  %v1321_v20 = vld [vmem:[#allocation11 + $0x8] sm:$0xff]  }
  0x7c   :  { %1096 = vmatmul.mubr.bf16.vlgmr.msra.gmra.mrb[0].mxu0 %v1317_v19  ;;  %1144 = vmatpush3.bf16.msra.mxu1 %v1641_v2 }
  0x7d   :  { %1124 = vmatpush3.bf16.msra.mxu0 %v1641_v2  ;;  %1145 = vmatprep.subr.bf16.mxu1 %v1515_v0 }
  0x7e   :  { %1125 = vmatprep.subr.bf16.mxu0 %v1515_v0  ;;  %1159 = vmatprep.mubr.msk.bf16.mxu1 %vm1516_vm0, %v1515_v0 }
  0x7f   :  { %1099 = vmatprep.mubr.bf16.mxu0 %v1318_v21  ;;  %v1324_v21 = vld [vmem:[#allocation11 + $0x20] sm:$0xff]  }
  0x80   :  { %1146 = vmatpush3.bf16.msra.mxu1 %v1644_v4 }
  0x81   :  { %1126 = vmatpush3.bf16.msra.mxu0 %v1644_v4  ;;  %1147 = vmatprep.subr.bf16.mxu1 %v1515_v0 }
  0x82   :  { %1127 = vmatprep.subr.bf16.mxu0 %v1515_v0 }
  0x84   :  { %1148 = vmatpush3.bf16.msra.mxu1 %v1648_v6  ;;  %1100 = vmatmul.mubr.bf16.gmra.mrb[4].mxu0 %v1319_v22  ;;  %v1325_v22 = vld [vmem:[#allocation11 + $0x28] sm:$0xff]  }
  0x85   :  { %1128 = vmatpush3.bf16.msra.mxu0 %v1648_v6  ;;  %1149 = vmatprep.subr.bf16.mxu1 %v1515_v0 }
  0x86   :  { %1129 = vmatprep.subr.bf16.mxu0 %v1515_v0  ;;  %1139 = vmatprep.mubr.msk.bf16.mxu0 %vm1516_vm0, %v1515_v0 }
  0x88   :  { %1150 = vmatpush3.bf16.msra.mxu1 %v1652_v8 }
  0x89   :  { %1130 = vmatpush3.bf16.msra.mxu0 %v1652_v8  ;;  %1151 = vmatprep.subr.bf16.mxu1 %v1515_v0 }
  0x8a   :  { %1131 = vmatprep.subr.bf16.mxu0 %v1515_v0 }
  0x8c   :  { %1152 = vmatpush3.bf16.msra.mxu1 %v1655_v10 }
  0x8d   :  { %1132 = vmatpush3.bf16.msra.mxu0 %v1655_v10  ;;  %1153 = vmatprep.subr.bf16.mxu1 %v1515_v0 }
  0x8e   :  { %1133 = vmatprep.subr.bf16.mxu0 %v1515_v0 }
  0x90   :  { %1154 = vmatpush3.bf16.msra.mxu1 %v1659_v13 }
  0x91   :  { %1134 = vmatpush3.bf16.msra.mxu0 %v1659_v13  ;;  %1155 = vmatprep.subr.bf16.mxu1 %v1515_v0 }
  0x92   :  { %1135 = vmatprep.subr.bf16.mxu0 %v1515_v0 }
  0x94   :  { %1156 = vmatpush3.bf16.msra.mxu1 %v1663_v15 }
  0x95   :  { %1136 = vmatpush3.bf16.msra.mxu0 %v1663_v15  ;;  %1157 = vmatprep.subr.bf16.mxu1 %v1515_v0 }
  0x96   :  { %1137 = vmatprep.subr.bf16.mxu0 %v1515_v0 }
  0x98   :  { %1158 = vmatpush3.bf16.msra.mxu1 %v1668_v17 }
  0x99   :  { %1138 = vmatpush3.bf16.msra.mxu0 %v1668_v17  ;;  %1183 = vmatprep.subr.bf16.mxu1 %v1515_v0 }
  0x9a   :  { %1163 = vmatprep.subr.bf16.mxu0 %v1515_v0 }
 0x14e   :  { %v388_v25 = vpop.f32.mrb[0].mxu1 }
 0x14f   :  { %v1097_v24 = vpop.f32.mrb[0].mxu0  ;;  %v1121_v27 = vpop.f32.mrb[1].mxu1 }
 0x150   :  { %v233_v26 = vpop.f32.mrb[1].mxu0  ;;  %v391_v30 = vpop.f32.mrb[2].mxu1  ;;  %v273_v48 = vadd.f32 %v1097_v24, %v1713_v23  ;;  %v1326_v24 = vld [vmem:[#allocation11 + $0x30] sm:$0xff]  }
 0x151   :  { %v271_v28 = vadd.f32 %v1713_v23, %v233_v26  ;;  %v1716_v29 = vpop.f32.mrb[2].mxu0  ;;  %v1122_v32 = vpop.f32.mrb[3].mxu1 }
 0x152   :  { %v236_v31 = vpop.f32.mrb[3].mxu0  ;;  %v274_v56 = vadd.f32 %v1716_v29, %v1713_v23 }
 0x153   :  { %v394_v33 = vadd.f32 %v388_v25, %v271_v28  ;;  %v272_v40 = vadd.f32 %v1713_v23, %v236_v31  ;;  %v1327_v25 = vld [vmem:[#allocation11 + $0x38] sm:$0xff]  }
 0x155   :  { %1328 = vtanh.f32 %v394_v33 }
 0x157   :  { %v1740_v36 = vpop.f32.mrb[4].mxu0 }
 0x158   :  { %v1742_v37 = vpop.f32.mrb[5].mxu0  ;;  %v277_v28 = vadd.f32 %v1740_v36, %v1713_v23 }
 0x159   :  { %v1744_v38 = vpop.f32.mrb[6].mxu0  ;;  %v275_v1 = vadd.f32 %v1713_v23, %v1742_v37  ;;  %v978_v37 = vld [vmem:[%s1879_s6] ss:$0 sm:$0xff]  ;;  %s1517_s6 = smov [#allocation13]  }
 0x15a   :  { %v1746_v39 = vpop.f32.mrb[7].mxu0  ;;  %s930_s19 = sshll.u32 %s1517_s6, 4  ;;  %s931_s19 = int_to_ptr.vmem [resolvable:$true] %s930_s19 }
 0x15b   :  { %s1454_s21 = scalar_lea.vmem %s931_s19, 128  ;;  %p1459_p13 = scmp.lt.s32.totalorder %s931_s19, %s931_s19 }
 0x15c   :  { %p1455_p12 = scmp.ne.s32.totalorder %s931_s19, %s1454_s21  ;;  %p1460_p0 = scmp.lt.s32.totalorder %s1454_s21, %s1454_s21 }
 0x15e   :  { %p1461_p1 = por %p1460_p0, %p1459_p13 }
 0x15f   :  { %v1718_v34 = vpop.eup %1328 }
 0x160   :  { %v399_v35 = vpack.c.bf16 %v1718_v34, %v1718_v34  ;;  %p1462_p2 = pnand %p1461_p1, %p1455_p12 }
 0x162   :  { %1140 = vmatmul.mubr.bf16.vlgmr.msra.gmra.mrb[8].mxu0 %v399_v35 }
 0x163   :  { %1164 = vmatpush3.bf16.msra.mxu0 %v1641_v2  ;;  %1179 = vmatprep.mubr.msk.bf16.mxu0 %vm1516_vm0, %v1515_v0 }
 0x164   :  { %1165 = vmatprep.subr.bf16.mxu0 %v1515_v0 }
 0x167   :  { %1166 = vmatpush3.bf16.msra.mxu0 %v1644_v4 }
 0x168   :  { %1167 = vmatprep.subr.bf16.mxu0 %v1515_v0 }
 0x16b   :  { %1168 = vmatpush3.bf16.msra.mxu0 %v1648_v6 }
 0x16c   :  { %1169 = vmatprep.subr.bf16.mxu0 %v1515_v0 }
 0x16f   :  { %1170 = vmatpush3.bf16.msra.mxu0 %v1652_v8 }
 0x170   :  { %1171 = vmatprep.subr.bf16.mxu0 %v1515_v0 }
 0x173   :  { %1172 = vmatpush3.bf16.msra.mxu0 %v1655_v10 }
 0x174   :  { %1173 = vmatprep.subr.bf16.mxu0 %v1515_v0 }
 0x177   :  { %1174 = vmatpush3.bf16.msra.mxu0 %v1659_v13 }
 0x178   :  { %1175 = vmatprep.subr.bf16.mxu0 %v1515_v0 }
 0x17b   :  { %1176 = vmatpush3.bf16.msra.mxu0 %v1663_v15 }
 0x17c   :  { %1177 = vmatprep.subr.bf16.mxu0 %v1515_v0 }
 0x17f   :  { %1178 = vmatpush3.bf16.msra.mxu0 %v1668_v17 }
 0x180   :  { %1203 = vmatprep.subr.bf16.mxu0 %v1515_v0 }
 0x235   :  { %v434_v41 = vpop.f32.mrb[8].mxu0 }
 0x236   :  { %v440_v42 = vadd.f32 %v434_v41, %v272_v40  ;;  %v1141_v43 = vpop.f32.mrb[9].mxu0 }
 0x237   :  { %v437_v44 = vpop.f32.mrb[10].mxu0 }
 0x238   :  { %1330 = vtanh.f32 %v440_v42  ;;  %v1142_v45 = vpop.f32.mrb[11].mxu0 }
 0x242   :  { %v1749_v46 = vpop.eup %1330 }
 0x243   :  { %v445_v47 = vpack.c.bf16 %v1749_v46, %v1749_v46 }
 0x245   :  { %1160 = vmatmul.mubr.bf16.vlgmr.msra.gmra.mrb[4].mxu1 %v445_v47 }
 0x246   :  { %1184 = vmatpush3.bf16.msra.mxu1 %v1641_v2  ;;  %1199 = vmatprep.mubr.msk.bf16.mxu1 %vm1516_vm0, %v1515_v0 }
 0x247   :  { %1185 = vmatprep.subr.bf16.mxu1 %v1515_v0 }
 0x24a   :  { %1186 = vmatpush3.bf16.msra.mxu1 %v1644_v4 }
 0x24b   :  { %1187 = vmatprep.subr.bf16.mxu1 %v1515_v0 }
 0x24e   :  { %1188 = vmatpush3.bf16.msra.mxu1 %v1648_v6 }
 0x24f   :  { %1189 = vmatprep.subr.bf16.mxu1 %v1515_v0 }
 0x252   :  { %1190 = vmatpush3.bf16.msra.mxu1 %v1652_v8 }
 0x253   :  { %1191 = vmatprep.subr.bf16.mxu1 %v1515_v0 }
 0x256   :  { %1192 = vmatpush3.bf16.msra.mxu1 %v1655_v10 }
 0x257   :  { %1193 = vmatprep.subr.bf16.mxu1 %v1515_v0 }
 0x25a   :  { %1194 = vmatpush3.bf16.msra.mxu1 %v1659_v13 }
 0x25b   :  { %1195 = vmatprep.subr.bf16.mxu1 %v1515_v0 }
 0x25e   :  { %1196 = vmatpush3.bf16.msra.mxu1 %v1663_v15 }
 0x25f   :  { %1197 = vmatprep.subr.bf16.mxu1 %v1515_v0 }
 0x262   :  { %1198 = vmatpush3.bf16.msra.mxu1 %v1668_v17 }
 0x263   :  { %1223 = vmatprep.subr.bf16.mxu1 %v1515_v0 }
 0x318   :  { %v480_v49 = vpop.f32.mrb[4].mxu1 }
 0x319   :  { %v486_v50 = vadd.f32 %v480_v49, %v273_v48  ;;  %v1161_v51 = vpop.f32.mrb[5].mxu1 }
 0x31a   :  { %v483_v52 = vpop.f32.mrb[6].mxu1 }
 0x31b   :  { %1332 = vtanh.f32 %v486_v50  ;;  %v1162_v53 = vpop.f32.mrb[7].mxu1 }
 0x325   :  { %v1772_v54 = vpop.eup %1332 }
 0x326   :  { %v491_v55 = vpack.c.bf16 %v1772_v54, %v1772_v54 }
 0x328   :  { %1180 = vmatmul.mubr.bf16.vlgmr.msra.gmra.mrb[12].mxu0 %v491_v55 }
 0x329   :  { %1204 = vmatpush3.bf16.msra.mxu0 %v1641_v2  ;;  %1219 = vmatprep.mubr.msk.bf16.mxu0 %vm1516_vm0, %v1515_v0 }
 0x32a   :  { %1205 = vmatprep.subr.bf16.mxu0 %v1515_v0 }
 0x32d   :  { %1206 = vmatpush3.bf16.msra.mxu0 %v1644_v4 }
 0x32e   :  { %1207 = vmatprep.subr.bf16.mxu0 %v1515_v0 }
 0x331   :  { %1208 = vmatpush3.bf16.msra.mxu0 %v1648_v6 }
 0x332   :  { %1209 = vmatprep.subr.bf16.mxu0 %v1515_v0 }
 0x335   :  { %1210 = vmatpush3.bf16.msra.mxu0 %v1652_v8 }
 0x336   :  { %1211 = vmatprep.subr.bf16.mxu0 %v1515_v0 }
 0x339   :  { %1212 = vmatpush3.bf16.msra.mxu0 %v1655_v10 }
 0x33a   :  { %1213 = vmatprep.subr.bf16.mxu0 %v1515_v0 }
 0x33d   :  { %1214 = vmatpush3.bf16.msra.mxu0 %v1659_v13 }
 0x33e   :  { %1215 = vmatprep.subr.bf16.mxu0 %v1515_v0 }
 0x341   :  { %1216 = vmatpush3.bf16.msra.mxu0 %v1663_v15 }
 0x342   :  { %1217 = vmatprep.subr.bf16.mxu0 %v1515_v0 }
 0x345   :  { %1218 = vmatpush3.bf16.msra.mxu0 %v1668_v17 }
 0x346   :  { %1243 = vmatprep.subr.bf16.mxu0 %v1515_v0 }
 0x3fb   :  { %v526_v57 = vpop.f32.mrb[12].mxu0 }
 0x3fc   :  { %v532_v58 = vadd.f32 %v526_v57, %v274_v56  ;;  %v1181_v59 = vpop.f32.mrb[13].mxu0 }
 0x3fd   :  { %v529_v60 = vpop.f32.mrb[14].mxu0 }
 0x3fe   :  { %1334 = vtanh.f32 %v532_v58  ;;  %v1182_v61 = vpop.f32.mrb[15].mxu0 }
 0x408   :  { %v1796_v62 = vpop.eup %1334 }
 0x409   :  { %v537_v63 = vpack.c.bf16 %v1796_v62, %v1796_v62  ;;  %v980_v26 = vpack.c.bf16 %v1796_v62, %v1772_v54 }
 0x40b   :  { %1200 = vmatmul.mubr.bf16.vlgmr.msra.gmra.mrb[8].mxu1 %v537_v63 }
 0x40c   :  { %1224 = vmatpush3.bf16.msra.mxu1 %v1641_v2  ;;  %1239 = vmatprep.mubr.msk.bf16.mxu1 %vm1516_vm0, %v1515_v0 }
 0x40d   :  { %1225 = vmatprep.subr.bf16.mxu1 %v1515_v0 }
 0x410   :  { %1226 = vmatpush3.bf16.msra.mxu1 %v1644_v4 }
 0x411   :  { %1227 = vmatprep.subr.bf16.mxu1 %v1515_v0 }
 0x414   :  { %1228 = vmatpush3.bf16.msra.mxu1 %v1648_v6 }
 0x415   :  { %1229 = vmatprep.subr.bf16.mxu1 %v1515_v0 }
 0x418   :  { %1230 = vmatpush3.bf16.msra.mxu1 %v1652_v8 }
 0x419   :  { %1231 = vmatprep.subr.bf16.mxu1 %v1515_v0 }
 0x41c   :  { %1232 = vmatpush3.bf16.msra.mxu1 %v1655_v10 }
 0x41d   :  { %1233 = vmatprep.subr.bf16.mxu1 %v1515_v0 }
 0x420   :  { %1234 = vmatpush3.bf16.msra.mxu1 %v1659_v13 }
 0x421   :  { %1235 = vmatprep.subr.bf16.mxu1 %v1515_v0 }
 0x424   :  { %1236 = vmatpush3.bf16.msra.mxu1 %v1663_v15 }
 0x425   :  { %1237 = vmatprep.subr.bf16.mxu1 %v1515_v0 }
 0x428   :  { %1238 = vmatpush3.bf16.msra.mxu1 %v1668_v17 }
 0x4de   :  { %v572_v3 = vpop.f32.mrb[8].mxu1 }
 0x4df   :  { %v578_v5 = vadd.f32 %v572_v3, %v275_v1  ;;  %v1201_v7 = vpop.f32.mrb[9].mxu1 }
 0x4e0   :  { %v575_v9 = vpop.f32.mrb[10].mxu1 }
 0x4e1   :  { %1336 = vtanh.f32 %v578_v5  ;;  %v1202_v11 = vpop.f32.mrb[11].mxu1 }
 0x4eb   :  { %v1337_v12 = vpop.eup %1336 }
 0x4ec   :  { %v583_v14 = vpack.c.bf16 %v1337_v12, %v1337_v12 }
 0x4ee   :  { %1220 = vmatmul.mubr.bf16.vlgmr.msra.gmra.mrb[16].mxu0 %v583_v14 }
 0x4ef   :  { %1244 = vmatpush3.bf16.msra.mxu0 %v1641_v2  ;;  %1259 = vmatprep.mubr.msk.bf16.mxu0 %vm1516_vm0, %v1515_v0  ;;  %v1320_v2 = vld [vmem:[#allocation11] sm:$0xff]  }
 0x4f0   :  { %1245 = vmatprep.subr.bf16.mxu0 %v1515_v0  ;;  %1263 = vmatprep.subr.bf16.mxu1 %v1320_v2 }
 0x4f3   :  { %1246 = vmatpush3.bf16.msra.mxu0 %v1644_v4  ;;  %v276_v4 = vadd.f32 %v1713_v23, %v1746_v39 }
 0x4f4   :  { %1247 = vmatprep.subr.bf16.mxu0 %v1515_v0 }
 0x4f7   :  { %1248 = vmatpush3.bf16.msra.mxu0 %v1648_v6 }
 0x4f8   :  { %1249 = vmatprep.subr.bf16.mxu0 %v1515_v0 }
 0x4fb   :  { %1250 = vmatpush3.bf16.msra.mxu0 %v1652_v8 }
 0x4fc   :  { %1251 = vmatprep.subr.bf16.mxu0 %v1515_v0 }
 0x4ff   :  { %1252 = vmatpush3.bf16.msra.mxu0 %v1655_v10 }
 0x500   :  { %1253 = vmatprep.subr.bf16.mxu0 %v1515_v0 }
 0x503   :  { %1254 = vmatpush3.bf16.msra.mxu0 %v1659_v13 }
 0x504   :  { %1255 = vmatprep.subr.bf16.mxu0 %v1515_v0 }
 0x507   :  { %1256 = vmatpush3.bf16.msra.mxu0 %v1663_v15  ;;  %v979_v15 = vpack.c.bf16 %v1749_v46, %v1718_v34  ;;  %v278_v46 = vadd.f32 %v1744_v38, %v1713_v23 }
 0x508   :  { %1257 = vmatprep.subr.bf16.mxu0 %v1515_v0  ;;  %v1322_v0 = vld [vmem:[#allocation11 + $0x10] sm:$0xff]  }
 0x50b   :  { %1258 = vmatpush3.bf16.msra.mxu0 %v1668_v17  ;;  %v1323_v17 = vld [vmem:[#allocation11 + $0x18] sm:$0xff]  }
 0x5c1   :  { %v618_v6 = vpop.f32.mrb[16].mxu0 }
 0x5c2   :  { %v624_v8 = vadd.f32 %v618_v6, %v276_v4  ;;  %v1221_v10 = vpop.f32.mrb[17].mxu0 }
 0x5c3   :  { %v621_v16 = vpop.f32.mrb[18].mxu0 }
 0x5c4   :  { %1338 = vtanh.f32 %v624_v8  ;;  %v1222_v18 = vpop.f32.mrb[19].mxu0 }
 0x5ce   :  { %v1339_v13 = vpop.eup %1338 }
 0x5cf   :  { %v629_v19 = vpack.c.bf16 %v1339_v13, %v1339_v13  ;;  %v981_v27 = vpack.c.bf16 %v1339_v13, %v1337_v12 }
 0x5d1   :  { %1240 = vmatmul.mubr.bf16.vlgmr.msra.gmra.mrb[12].mxu1 %v629_v19 }
 0x5d2   :  { %1264 = vmatpush3.bf16.msra.mxu1 %v1320_v2  ;;  %1279 = vmatprep.mubr.bf16.mxu1 %v979_v15 }
 0x5d3   :  { %1265 = vmatprep.subr.bf16.mxu1 %v1321_v20 }
 0x5d6   :  { %1266 = vmatpush3.bf16.msra.mxu1 %v1321_v20 }
 0x5d7   :  { %1267 = vmatprep.subr.bf16.mxu1 %v1322_v0 }
 0x5da   :  { %1268 = vmatpush3.bf16.msra.mxu1 %v1322_v0 }
 0x5db   :  { %1269 = vmatprep.subr.bf16.mxu1 %v1323_v17 }
 0x5de   :  { %1270 = vmatpush3.bf16.msra.mxu1 %v1323_v17 }
 0x5df   :  { %1271 = vmatprep.subr.bf16.mxu1 %v1324_v21 }
 0x5e2   :  { %1272 = vmatpush3.bf16.msra.mxu1 %v1324_v21 }
 0x5e3   :  { %1273 = vmatprep.subr.bf16.mxu1 %v1325_v22 }
 0x5e6   :  { %1274 = vmatpush3.bf16.msra.mxu1 %v1325_v22 }
 0x5e7   :  { %1275 = vmatprep.subr.bf16.mxu1 %v1326_v24 }
 0x5ea   :  { %1276 = vmatpush3.bf16.msra.mxu1 %v1326_v24 }
 0x5eb   :  { %1277 = vmatprep.subr.bf16.mxu1 %v1327_v25 }
 0x5ee   :  { %1278 = vmatpush3.bf16.msra.mxu1 %v1327_v25 }
 0x5f1   :  { %1280 = vmatmul.mubr.bf16.vlgmr.msra.gmra.mrb[16].mxu1 %v980_v26 }
 0x5f2   :  { %1283 = vmatprep.mubr.bf16.mxu1 %v981_v27 }
 0x6a4   :  { %v664_v29 = vpop.f32.mrb[12].mxu1 }
 0x6a5   :  { %v670_v30 = vadd.f32 %v664_v29, %v277_v28  ;;  %v1241_v31 = vpop.f32.mrb[13].mxu1 }
 0x6a6   :  { %v667_v32 = vpop.f32.mrb[14].mxu1 }
 0x6a7   :  { %1340 = vtanh.f32 %v670_v30  ;;  %v1242_v33 = vpop.f32.mrb[15].mxu1 }
 0x6b1   :  { %v1341_v34 = vpop.eup %1340 }
 0x6b2   :  { %v675_v35 = vpack.c.bf16 %v1341_v34, %v1341_v34 }
 0x6b4   :  { %1260 = vmatmul.mubr.bf16.vlgmr.msra.gmra.mrb[20].mxu0 %v675_v35 }
 0x6c4   :  { %v1281_v39 = vpop.f32.mrb[16].mxu1 }
 0x6c5   :  { %v898_v40 = vadd.f32 %v1281_v39, %v978_v37  ;;  %v858_v41 = vpop.f32.mrb[17].mxu1 }
 0x6c6   :  { %v896_v42 = vadd.f32 %v978_v37, %v858_v41  ;;  %v1282_v43 = vpop.f32.mrb[18].mxu1 }
 0x6c7   :  { %906 = vst [vmem:[#allocation12 + $0x10] sm:$0xff] %v898_v40  ;;  %v899_v36 = vadd.f32 %v1282_v43, %v978_v37  ;;  %v861_v44 = vpop.f32.mrb[19].mxu1 }
 0x6c8   :  { %904 = vst [vmem:[#allocation12] sm:$0xff] %v896_v42  ;;  %v897_v45 = vadd.f32 %v978_v37, %v861_v44 }
 0x6c9   :  { %907 = vst [vmem:[#allocation12 + $0x18] sm:$0xff] %v899_v36 }
 0x6ca   :  { %905 = vst [vmem:[#allocation12 + $0x8] sm:$0xff] %v897_v45 }
 0x787   :  { %v710_v47 = vpop.f32.mrb[20].mxu0 }
 0x788   :  { %v716_v48 = vadd.f32 %v710_v47, %v278_v46  ;;  %v1261_v49 = vpop.f32.mrb[21].mxu0 }
 0x789   :  { %v713_v50 = vpop.f32.mrb[22].mxu0 }
 0x78a   :  { %1342 = vtanh.f32 %v716_v48  ;;  %v1262_v51 = vpop.f32.mrb[23].mxu0 }
 0x794   :  { %v1343_v52 = vpop.eup %1342 }
 0x795   :  { %719 = vst [vmem:[#allocation13] sm:$0xff] %v1343_v52  ;;  %v982_v53 = vpack.c.bf16 %v1343_v52, %v1341_v34 }
 0x797   :  { %1284 = vmatmul.mubr.bf16.gmra.mrb[20].mxu1 %v982_v53 }
 0x798   :  { %1465 = shalt.err (!%p1462_p2)
}
 0x799   :  { %s1466_s24 = scalar_lea.hbm %s1881_s8, 128 }
 0x79a   :  { %p1467_p3 = scmp.ne.s32.totalorder %s1881_s8, %s1466_s24  ;;  %p1470_p4 = scmp.lt.u32.totalorder %s1466_s24, %s1881_s8 }
 0x79c   :  { %p1472_p5 = pnand %p1470_p4, %p1467_p3 }
 0x79e   :  { %1475 = shalt.err (!%p1472_p5)
}
 0x79f   :  { %933 = dma.vmem_to_hbm [thread:$0]  %s931_s19, 128, %s1881_s8, [#allocation14]  }
 0x7a0   :  { %s1518_s0 = smov [#allocation12]  }
 0x7a1   :  { %s917_s20 = sshll.u32 %s1518_s0, 4  ;;  %s918_s20 = int_to_ptr.vmem [resolvable:$true] %s917_s20 }
 0x7a2   :  { %s1476_s10 = scalar_lea.vmem %s918_s20, 1024  ;;  %p1481_p7 = scmp.lt.s32.totalorder %s918_s20, %s918_s20 }
 0x7a3   :  { %p1477_p6 = scmp.ne.s32.totalorder %s918_s20, %s1476_s10  ;;  %p1482_p8 = scmp.lt.s32.totalorder %s1476_s10, %s1476_s10 }
 0x7a5   :  { %p1483_p9 = por %p1482_p8, %p1481_p7 }
 0x7a7   :  { %p1484_p10 = pnand %p1483_p9, %p1477_p6 }
 0x86a   :  { %v1285_v23 = vpop.f32.mrb[20].mxu1 }
 0x86b   :  { %v902_v38 = vadd.f32 %v1285_v23, %v978_v37  ;;  %v874_v54 = vpop.f32.mrb[21].mxu1 }
 0x86c   :  { %v900_v55 = vadd.f32 %v978_v37, %v874_v54  ;;  %v1286_v56 = vpop.f32.mrb[22].mxu1 }
 0x86d   :  { %910 = vst [vmem:[#allocation12 + $0x30] sm:$0xff] %v902_v38  ;;  %v903_v57 = vadd.f32 %v1286_v56, %v978_v37  ;;  %v877_v58 = vpop.f32.mrb[23].mxu1 }
 0x86e   :  { %908 = vst [vmem:[#allocation12 + $0x20] sm:$0xff] %v900_v55  ;;  %v901_v59 = vadd.f32 %v978_v37, %v877_v58 }
 0x86f   :  { %911 = vst [vmem:[#allocation12 + $0x38] sm:$0xff] %v903_v57 }
 0x870   :  { %909 = vst [vmem:[#allocation12 + $0x28] sm:$0xff] %v901_v59 }
 0x871   :  { %1487 = shalt.err (!%p1484_p10)
}
 0x872   :  { %s1488_s12 = scalar_lea.hbm %s1880_s7, 1024 }
 0x873   :  { %p1489_p11 = scmp.ne.s32.totalorder %s1880_s7, %s1488_s12  ;;  %p1492_p12 = scmp.lt.u32.totalorder %s1488_s12, %s1880_s7 }
 0x875   :  { %p1494_p13 = pnand %p1492_p12, %p1489_p11 }
 0x877   :  { %1497 = shalt.err (!%p1494_p13)
}
 0x878   :  { %s1519_s17 = smov 128   ;;  %s1520_s3 = smov 8  }
 0x879   :  { %923 = dma.vmem_to_hbm [thread:$0]  %s918_s20, 1024, %s1880_s7, [#allocation5], %s1519_s17, %s1519_s17, %s1520_s3  }
 0x87a   :  { %1504 = dma.done.wait [#allocation5], 1024  }
 0x87b   :  { %1505 = vsyncadd [#allocation5], 4294966272 }
 0x87c   :  { %1506 = dma.done.wait [#allocation14], 128  }
 0x87d   :  { %1507 = vsyncadd [#allocation14], 4294967168 }
 0x87e   :  { %940 = vsyncpa [#allocation4], 1 }
 0x87f   :  { %941 = vsyncpa [#allocation7], 1 }
 0x880   :  { %942 = vsyncpa [#allocation10], 1 }
 0x881   :  { %943 = vsyncpa [#allocation5], 1 }
 0x882   :  { %944 = vsyncpa [#allocation14], 1 }

</bundles_post_ra>
